<compile_context>
chip_gen: v6e
topology: v6e:2x2x1
jax: 0.10.0
libtpu: 0.0.40
codegen_flags: <defaults>
</compile_context>

<pallas_src>
import jax
import jax.numpy as jnp
from jax.experimental import pallas as pl
from jax.experimental.pallas import tpu as pltpu

INPUT_SIZE = 25
HIDDEN_SIZE = 128
NUM_CLASS = 3
NUMBER_HIDDEN = 1   # class default: one Linear+ReLU hidden block, then the classifier

DEFAULT_BLOCK_B = 1024  # batch tile (rows); streamed, double-buffered


def mlp_kernel(x_ref, w1_ref, b1_ref, w2_ref, b2_ref, out_ref):
    # (TB, 25) bf16 @ (25, 128) bf16 -> f32 accumulate on the MXU
    h = jnp.dot(x_ref[...], w1_ref[...], preferred_element_type=jnp.float32)
    # bias + ReLU in f32 on the VPU (no bf16 elementwise, keeps v5e happy)
    h = jnp.maximum(h + b1_ref[...], 0.0)
    # (TB, 128) bf16 @ (128, 3) bf16 -> f32
    o = jnp.dot(h.astype(w2_ref.dtype), w2_ref[...],
                preferred_element_type=jnp.float32)
    out_ref[...] = o + b2_ref[...]


def _round_up(n, m):
    return ((n + m - 1) // m) * m


def server_model_forward(x, w1, b1, w2, b2, *, block_b=DEFAULT_BLOCK_B,
                         mxu_dtype=jnp.bfloat16):
    """x: (B, 25) f32 -> (B, 3) f32 logits."""
    B = x.shape[0]

    # Batch tile: multiple of 8 (sublane rule), never larger than the padded batch.
    tb = min(block_b, _round_up(B, 8))
    b_pad = _round_up(B, tb)

    xp = x if b_pad == B else jnp.pad(x, ((0, b_pad - B), (0, 0)))

    # bf16 inputs for the MXU; accumulation stays f32 inside the kernel.
    xp = xp.astype(mxu_dtype)
    w1c = w1.astype(mxu_dtype)
    w2c = w2.astype(mxu_dtype)
    b1c = b1.astype(jnp.float32)
    b2c = b2.astype(jnp.float32)

    grid = (b_pad // tb,)

    flops = 2 * b_pad * (INPUT_SIZE * HIDDEN_SIZE + HIDDEN_SIZE * NUM_CLASS)
    bytes_accessed = int(
        b_pad * (INPUT_SIZE * xp.dtype.itemsize + NUM_CLASS * 4)
        + w1c.size * w1c.dtype.itemsize + w2c.size * w2c.dtype.itemsize
        + b1c.size * 4 + b2c.size * 4)

    out = pl.pallas_call(
        mlp_kernel,
        out_shape=jax.ShapeDtypeStruct((b_pad, NUM_CLASS), jnp.float32),
        grid=grid,
        in_specs=[
            pl.BlockSpec((tb, INPUT_SIZE), lambda i: (i, 0)),           # x: streamed
            pl.BlockSpec((INPUT_SIZE, HIDDEN_SIZE), lambda i: (0, 0)),  # w1: resident
            pl.BlockSpec((1, HIDDEN_SIZE), lambda i: (0, 0)),           # b1: resident
            pl.BlockSpec((HIDDEN_SIZE, NUM_CLASS), lambda i: (0, 0)),   # w2: resident
            pl.BlockSpec((1, NUM_CLASS), lambda i: (0, 0)),             # b2: resident
        ],
        out_specs=pl.BlockSpec((tb, NUM_CLASS), lambda i: (i, 0)),
        compiler_params=pltpu.CompilerParams(
            dimension_semantics=("parallel",)),  # shard batch tiles across TCs on v7x
        cost_estimate=pl.CostEstimate(flops=flops, transcendentals=0,
                                      bytes_accessed=bytes_accessed),
    )(xp, w1c, b1c, w2c, b2c)

    if b_pad != B:
        out = out[:B]
    return out


def _reference(x, w1, b1, w2, b2, mxu_dtype=jnp.bfloat16):
    # Mirrors the kernel's numerics (bf16 MXU inputs, f32 accumulate/elementwise).
    h = jnp.dot(x.astype(mxu_dtype), w1.astype(mxu_dtype),
                preferred_element_type=jnp.float32)
    h = jnp.maximum(h + b1, 0.0)
    o = jnp.dot(h.astype(mxu_dtype), w2.astype(mxu_dtype),
                preferred_element_type=jnp.float32)
    return o + b2


def init_params(key):
    # Deterministic init mimicking PyTorch Linear default (uniform +/- 1/sqrt(fan_in)).
    k1, k2, k3, k4 = jax.random.split(key, 4)
    bnd1 = 1.0 / jnp.sqrt(INPUT_SIZE)
    bnd2 = 1.0 / jnp.sqrt(HIDDEN_SIZE)
    w1 = jax.random.uniform(k1, (INPUT_SIZE, HIDDEN_SIZE), jnp.float32, -bnd1, bnd1)
    b1 = jax.random.uniform(k2, (1, HIDDEN_SIZE), jnp.float32, -bnd1, bnd1)
    w2 = jax.random.uniform(k3, (HIDDEN_SIZE, NUM_CLASS), jnp.float32, -bnd2, bnd2)
    b2 = jax.random.uniform(k4, (1, NUM_CLASS), jnp.float32, -bnd2, bnd2)
    return w1, b1, w2, b2


if __name__ == "__main__":
    key = jax.random.PRNGKey(0)
    kx, kp, kx2 = jax.random.split(key, 3)
    B = 8
    x = jax.random.normal(kx, (B, INPUT_SIZE), jnp.float32)
    w1, b1, w2, b2 = init_params(kp)

    out = server_model_forward(x, w1, b1, w2, b2)
    jax.block_until_ready(out)

    ref_bf16 = _reference(x, w1, b1, w2, b2)
    ref_f32 = jnp.maximum(x @ w1 + b1, 0.0) @ w2 + b2
    assert out.shape == (B, NUM_CLASS)
    assert jnp.allclose(out, ref_bf16, atol=1e-3, rtol=1e-3)   # matches kernel numerics
    assert jnp.allclose(out, ref_f32, atol=3e-2, rtol=3e-2)    # close to full-f32 forward

    # Exercise the multi-tile streaming path (grid=(3,), weights stay resident).
    B2 = 24
    x2 = jax.random.normal(kx2, (B2, INPUT_SIZE), jnp.float32)
    out2 = server_model_forward(x2, w1, b1, w2, b2, block_b=8)
    jax.block_until_ready(out2)
    assert jnp.allclose(out2, _reference(x2, w1, b1, w2, b2), atol=1e-3, rtol=1e-3)

    print("KERNEL_OK")
</pallas_src>

<mosaic_0001>
module attributes {stable_mosaic.version = 11 : i64} {
  func.func @mlp_kernel(%arg0: i32, %arg1: memref<8x25xbf16, #tpu.memory_space<vmem>>, %arg2: memref<25x128xbf16, #tpu.memory_space<vmem>>, %arg3: memref<1x128xf32, #tpu.memory_space<vmem>>, %arg4: memref<128x3xbf16, #tpu.memory_space<vmem>>, %arg5: memref<1x3xf32, #tpu.memory_space<vmem>>, %arg6: memref<8x3xf32, #tpu.memory_space<vmem>>) attributes {dimension_semantics = [#tpu.dimension_semantics<parallel>], iteration_bounds = array<i64: 1>, scalar_prefetch = 0 : i64, scratch_operands = 0 : i64, tpu.core_type = #tpu.core_type<tc>, window_params = [{transform_indices = @transform_0, window_bounds = array<i64: 8, 25>}, {pipeline_mode = #tpu.pipeline_mode<synchronous>, transform_indices = @transform_1, window_bounds = array<i64: 25, 128>}, {pipeline_mode = #tpu.pipeline_mode<synchronous>, transform_indices = @transform_2, window_bounds = array<i64: 1, 128>}, {pipeline_mode = #tpu.pipeline_mode<synchronous>, transform_indices = @transform_3, window_bounds = array<i64: 128, 3>}, {pipeline_mode = #tpu.pipeline_mode<synchronous>, transform_indices = @transform_4, window_bounds = array<i64: 1, 3>}, {transform_indices = @transform_5, window_bounds = array<i64: 8, 3>}]} {
    %c0 = arith.constant 0 : index
    %c0_0 = arith.constant 0 : index
    %0 = vector.load %arg1[%c0, %c0_0] : memref<8x25xbf16, #tpu.memory_space<vmem>>, vector<8x25xbf16>
    %c0_1 = arith.constant 0 : index
    %c0_2 = arith.constant 0 : index
    %1 = vector.load %arg2[%c0_1, %c0_2] : memref<25x128xbf16, #tpu.memory_space<vmem>>, vector<25x128xbf16>
    %cst = arith.constant dense<0.000000e+00> : vector<8x128xf32>
    %2 = tpu.matmul %0, %1, %cst {dimension_numbers = #tpu.dot_dimension_numbers<[1], [0], [0], [1], [0, 0, 1, 1], [], []>} : vector<8x25xbf16>, vector<25x128xbf16>, vector<8x128xf32> -> vector<8x128xf32>
    %c0_3 = arith.constant 0 : index
    %c0_4 = arith.constant 0 : index
    %3 = vector.load %arg3[%c0_3, %c0_4] : memref<1x128xf32, #tpu.memory_space<vmem>>, vector<1x128xf32>
    %4 = vector.broadcast %3 : vector<1x128xf32> to vector<8x128xf32>
    %5 = arith.addf %2, %4 : vector<8x128xf32>
    %cst_5 = arith.constant 0.000000e+00 : f32
    %6 = vector.broadcast %cst_5 : f32 to vector<8x128xf32>
    %7 = arith.maximumf %5, %6 : vector<8x128xf32>
    %8 = arith.truncf %7 : vector<8x128xf32> to vector<8x128xbf16>
    %c0_6 = arith.constant 0 : index
    %c0_7 = arith.constant 0 : index
    %9 = vector.load %arg4[%c0_6, %c0_7] : memref<128x3xbf16, #tpu.memory_space<vmem>>, vector<128x3xbf16>
    %cst_8 = arith.constant dense<0.000000e+00> : vector<8x3xf32>
    %10 = tpu.matmul %8, %9, %cst_8 {dimension_numbers = #tpu.dot_dimension_numbers<[1], [0], [0], [1], [0, 0, 1, 1], [], []>} : vector<8x128xbf16>, vector<128x3xbf16>, vector<8x3xf32> -> vector<8x3xf32>
    %c0_9 = arith.constant 0 : index
    %c0_10 = arith.constant 0 : index
    %11 = vector.load %arg5[%c0_9, %c0_10] : memref<1x3xf32, #tpu.memory_space<vmem>>, vector<1x3xf32>
    %12 = vector.broadcast %11 : vector<1x3xf32> to vector<8x3xf32>
    %13 = arith.addf %10, %12 : vector<8x3xf32>
    %c0_11 = arith.constant 0 : index
    %c0_12 = arith.constant 0 : index
    %14 = vector.load %arg6[%c0_11, %c0_12] : memref<8x3xf32, #tpu.memory_space<vmem>>, vector<8x3xf32>
    tpu.vector_store %arg6[%c0_11, %c0_12], %13 {strides = array<i32>} : memref<8x3xf32, #tpu.memory_space<vmem>>, vector<8x3xf32>,
    return
  }
  func.func @transform_0(%arg0: i32) -> (i32, i32) {
    %c0_i32 = arith.constant 0 : i32
    %c0_i32_0 = arith.constant 0 : i32
    return %arg0, %c0_i32 : i32, i32
  }
  func.func @transform_1(%arg0: i32) -> (i32, i32) {
    %c0_i32 = arith.constant 0 : i32
    %c0_i32_0 = arith.constant 0 : i32
    %c0_i32_1 = arith.constant 0 : i32
    return %c0_i32, %c0_i32_0 : i32, i32
  }
  func.func @transform_2(%arg0: i32) -> (i32, i32) {
    %c0_i32 = arith.constant 0 : i32
    %c0_i32_0 = arith.constant 0 : i32
    %c0_i32_1 = arith.constant 0 : i32
    return %c0_i32, %c0_i32_0 : i32, i32
  }
  func.func @transform_3(%arg0: i32) -> (i32, i32) {
    %c0_i32 = arith.constant 0 : i32
    %c0_i32_0 = arith.constant 0 : i32
    %c0_i32_1 = arith.constant 0 : i32
    return %c0_i32, %c0_i32_0 : i32, i32
  }
  func.func @transform_4(%arg0: i32) -> (i32, i32) {
    %c0_i32 = arith.constant 0 : i32
    %c0_i32_0 = arith.constant 0 : i32
    %c0_i32_1 = arith.constant 0 : i32
    return %c0_i32, %c0_i32_0 : i32, i32
  }
  func.func @transform_5(%arg0: i32) -> (i32, i32) {
    %c0_i32 = arith.constant 0 : i32
    %c0_i32_0 = arith.constant 0 : i32
    return %arg0, %c0_i32 : i32, i32
  }
}

</mosaic_0001>

<bundles_post_ra>
// kernel: tpu_custom_call.1
= control target key start
LH: loop header
LB: loop body
LE: loop exit
PB: predicated region body
PF: predicated region fallthrough
CT: control target
= control target key end

     0   :  { %vm48_vm0 = vcmask 1043456   ;;  %vm49_vm1 = vcmask 1044480   ;;  %v280_v0 = vmov 0.0   ;;  %v281_v2 = vmov 65535   ;;  %s355_s1 = inlined_call_operand.vmem [shape: bf16[25,128], index: 1, kind: input, shape index: {}]   ;;  %s356_s3 = inlined_call_operand.vmem [shape: bf16[128,3], index: 3, kind: input, shape index: {}]   ;;  %s357_s0 = inlined_call_operand.vmem [shape: bf16[8,25], index: 0, kind: input, shape index: {}]   ;;  %s358_s2 = inlined_call_operand.vmem [shape: f32[1,128], index: 2, kind: input, shape index: {}]   ;;  %s359_s4 = inlined_call_operand.vmem [shape: f32[1,3], index: 4, kind: input, shape index: {}]   ;;  %s360_s5 = inlined_call_operand.vmem [shape: f32[8,3], index: 5, kind: output, shape index: {}]  }
   0x1   :  { %239 = vmatprep.subr.bf16.mxu0 %v280_v0  ;;  %v270_v1 = vld [vmem:[%s355_s1 + $0x8] sm:$0x1f]   ;;  %247 = vmatprep.subr.bf16.mxu1 %v280_v0  ;;  %v50_v3 = vsel %vm48_vm0, 4294967295, %v281_v2  ;;  %v272_v5 = vld [vmem:[%s356_s3 + $0x38] sm:$0xff]   ;;  %vm282_vm2 = vmmov 0   ;;  %v273_v7 = vld [vmem:[%s356_s3 + $0x30] sm:$0xff]  }
   0x2   :  { %v51_v4 = vsel %vm49_vm1, %v50_v3, 0  ;;  %243 = vmatprep.mubr.msk.bf16.mxu0 %vm282_vm2, %v280_v0  ;;  %263 = vmatprep.mubr.msk.bf16.mxu1 %vm282_vm2, %v280_v0  ;;  %v271_v8 = vld [vmem:[%s355_s1] sm:$0xff]   ;;  %vm44_vm3 = vcmask 203776   ;;  %v274_v10 = vld [vmem:[%s356_s3 + $0x28] sm:$0xff]   ;;  %v276_v12 = vld [vmem:[%s356_s3 + $0x18] sm:$0xff]   ;;  %vm208_vm4 = vcmask 23552  }
   0x3   :  { %v53_v6 = vand.u32 %v270_v1, %v51_v4  ;;  %248 = vmatpush3.bf16.msra.mxu1 %v272_v5  ;;  %v21_v9 = vld [vmem:[%s357_s0] sm:$0xf]  ;;  %v277_v13 = vld [vmem:[%s356_s3 + $0x10] sm:$0xff]   ;;  %v278_v14 = vld [vmem:[%s356_s3 + $0x8] sm:$0xff]  }
   0x4   :  { %249 = vmatprep.subr.bf16.mxu1 %v280_v0  ;;  %v275_v11 = vld [vmem:[%s356_s3 + $0x20] sm:$0xff]  }
   0x5   :  { %240 = vmatpush3.bf16.msra.mxu0 %v53_v6  ;;  %v279_v15 = vld [vmem:[%s356_s3] sm:$0xff]  }
   0x6   :  { %241 = vmatprep.subr.bf16.mxu0 %v280_v0  ;;  %v214_v16 = vld [vmem:[%s358_s2] ss:$0 sm:$0xff] }
   0x7   :  { %250 = vmatpush3.bf16.msra.mxu1 %v273_v7  ;;  %v218_v24 = vld [vmem:[%s359_s4] ss:$0 sm:$0xff] }
   0x8   :  { %251 = vmatprep.subr.bf16.mxu1 %v280_v0 }
   0x9   :  { %242 = vmatpush3.bf16.msra.mxu0 %v271_v8 }
   0xb   :  { %252 = vmatpush3.bf16.msra.mxu1 %v274_v10 }
   0xc   :  { %244 = vmatmul.mubr.msk.bf16.vlgmr.msra.gmra.mxu0 %vm44_vm3, %v21_v9  ;;  %253 = vmatprep.subr.bf16.mxu1 %v280_v0 }
   0xf   :  { %254 = vmatpush3.bf16.msra.mxu1 %v275_v11 }
  0x10   :  { %255 = vmatprep.subr.bf16.mxu1 %v280_v0 }
  0x13   :  { %256 = vmatpush3.bf16.msra.mxu1 %v276_v12 }
  0x14   :  { %257 = vmatprep.subr.bf16.mxu1 %v280_v0 }
  0x17   :  { %258 = vmatpush3.bf16.msra.mxu1 %v277_v13 }
  0x18   :  { %259 = vmatprep.subr.bf16.mxu1 %v280_v0 }
  0x1b   :  { %260 = vmatpush3.bf16.msra.mxu1 %v278_v14 }
  0x1c   :  { %261 = vmatprep.subr.bf16.mxu1 %v280_v0 }
  0x1f   :  { %262 = vmatpush3.bf16.msra.mxu1 %v279_v15 }
  0xcc   :  { %v89_v17 = vpop.f32.mrf.mxu0 }
  0xcd   :  { %v90_v18 = vadd.f32 %v214_v16, %v89_v17 }
  0xce   :  { %v245_v19 = vpop.f32.mrf.mxu0 }
  0xcf   :  { %v95_v20 = vmax.f32 %v90_v18, 0.0 }
  0xd0   :  { %v92_v21 = vpop.f32.mrf.mxu0 }
  0xd1   :  { %v96_v22 = vpack.c.bf16 %v95_v20, %v95_v20 }
  0xd2   :  { %v246_v23 = vpop.f32.mrf.mxu0 }
  0xd3   :  { %264 = vmatmul.mubr.bf16.vlgmr.msra.gmra.mxu1 %v96_v22 }
 0x193   :  { %v202_v25 = vpop.f32.mrf.mxu1 }
 0x194   :  { %v203_v26 = vadd.f32 %v218_v24, %v202_v25 }
 0x195   :  { %v265_v27 = vpop.f32.mrf.mxu1 }
 0x196   :  { %209 = vst.msk [vmem:[%s360_s5] sm:$0xff] %vm208_vm4, %v203_v26 }
 0x197   :  { %v205_v28 = vpop.f32.mrf.mxu1 }
 0x199   :  { %v266_v29 = vpop.f32.mrf.mxu1 }

</bundles_post_ra>
